<compile_context>
chip_gen: v6e
topology: v6e:2x2x1
jax: 0.10.0
libtpu: 0.0.40
codegen_flags: <defaults>
</compile_context>

<pallas_src>
import jax
import jax.numpy as jnp
from jax.experimental import pallas as pl
from jax.experimental.pallas import tpu as pltpu


def _round_up(v, m):
    return (v + m - 1) // m * m


def _embedding_kernel(x_ref, w_ref, b_ref, o_ref):
    # x_ref: [TM, L], w_ref: [L, D], b_ref: [1, D], o_ref: [TM, D]
    z = jnp.dot(x_ref[...], w_ref[...], preferred_element_type=jnp.float32)
    z = z + b_ref[...]                                  # bias broadcast over rows
    m = jnp.max(z, axis=-1, keepdims=True)              # numerically stable softmax
    e = jnp.exp(z - m)
    denom = jnp.sum(e, axis=-1, keepdims=True)
    # Exact reciprocal: the 1e-5 self-test tolerance rules out raw approx=True;
    # the divide is only over a (TM,1) column so it is not on the critical path.
    o_ref[...] = (e * pl.reciprocal(denom, approx=False)).astype(o_ref.dtype)


def prepare_embedding_params(weight, bias):
    """One-time parameter prep (call at init, NOT per forward pass).

    weight: [D, L] in PyTorch nn.Linear layout, bias: [D].
    Returns (w_p: [L, D], b_p: [1, D]) in f32.  No padding: block dims equal
    the full array dims inside the kernel, so no lane/sublane padding is needed.
    """
    w_p = jnp.asarray(weight, jnp.float32).T            # [L, D]
    b_p = jnp.asarray(bias, jnp.float32).reshape(1, -1)  # [1, D]
    return w_p, b_p


def _default_vmem_limit_bytes():
    """Generation-aware scoped-VMEM cap: ~40 MiB on v7x (64 MiB per TC),
    64 MiB on v5e/v6e (128 MiB physical)."""
    phys = None
    try:
        info = pltpu.get_tpu_info()
        phys = getattr(info, "vmem_capacity_bytes", None)
    except Exception:
        phys = None
    if not phys:
        phys = 64 * 1024 * 1024                         # conservative: v7x per-TC
    return int(min(64 * 1024 * 1024, 0.625 * phys))


def embedding_forward(x, w_p, b_p, *, out_dtype=None, vmem_limit_bytes=None):
    """x: [B, S, L] float32; (w_p, b_p) from prepare_embedding_params."""
    B, S, L = x.shape
    Lw, D = w_p.shape
    assert Lw == L, "weight len_seq does not match input"
    out_dtype = x.dtype if out_dtype is None else out_dtype
    if vmem_limit_bytes is None:
        vmem_limit_bytes = _default_vmem_limit_bytes()

    M = B * S
    x2d = x.reshape(M, L).astype(jnp.float32)           # metadata-only reshape

    # --- row-tile size from a VMEM budget ----------------------------------
    out_bytes = jnp.dtype(out_dtype).itemsize
    weight_bytes = 2 * (L * D + D) * 4                  # resident W/b, counted dbl-buffered
    per_row_bytes = 2 * (L * 4 + D * out_bytes) + 2 * D * 4  # dbl-buf x/out + f32 z,e scratch
    budget = int(0.8 * vmem_limit_bytes)
    tm = max(8, (budget - weight_bytes) // per_row_bytes)
    tm = min(int(tm), 1024)                             # amortize ~0.35us/grid-step overhead
    tm = max(8, (tm // 8) * 8)                          # sublane multiple
    tm = min(tm, _round_up(M, 8))
    # v7x has 2 TensorCores sharing the "parallel" axis: keep >= 2 grid steps.
    if M >= 16 and pl.cdiv(M, tm) < 2:
        tm = max(8, _round_up(pl.cdiv(M, 2), 8))

    out2d = pl.pallas_call(
        _embedding_kernel,
        out_shape=jax.ShapeDtypeStruct((M, D), out_dtype),
        grid=(pl.cdiv(M, tm),),                         # ragged last tile: rows are
        in_specs=[                                      # independent, unwritten rows discarded
            pl.BlockSpec((tm, L), lambda i: (i, 0)),    # x: tiled over rows
            pl.BlockSpec((L, D), lambda i: (0, 0)),     # weight: VMEM-resident
            pl.BlockSpec((1, D), lambda i: (0, 0)),     # bias:   VMEM-resident
        ],
        out_specs=pl.BlockSpec((tm, D), lambda i: (i, 0)),
        compiler_params=pltpu.CompilerParams(
            dimension_semantics=("parallel",),          # pure data-parallel axis
            vmem_limit_bytes=int(vmem_limit_bytes),
        ),
    )(x2d, w_p, b_p)

    return out2d.reshape(B, S, D)                       # contiguous: free reshape, no slice


def _reference(x, weight, bias):
    z = jnp.einsum("bsl,dl->bsd", x, weight) + bias
    return jax.nn.softmax(z, axis=-1)


if __name__ == "__main__":
    # Small shapes consistent with the module: len_seq=16, d_model=32.
    B, S, LEN_SEQ, D_MODEL = 2, 8, 16, 32

    key = jax.random.PRNGKey(0)
    kx, kw, kb = jax.random.split(key, 3)

    # Deterministic parameter init (same distribution shape as nn.Linear default).
    bound = 1.0 / (LEN_SEQ ** 0.5)
    weight = jax.random.uniform(kw, (D_MODEL, LEN_SEQ), jnp.float32, -bound, bound)
    bias = jax.random.uniform(kb, (D_MODEL,), jnp.float32, -bound, bound)

    x = jax.random.normal(kx, (B, S, LEN_SEQ), jnp.float32)

    # One-time param prep (transpose only), then the forward pass.
    w_p, b_p = prepare_embedding_params(weight, bias)
    out = embedding_forward(x, w_p, b_p)
    out = jax.block_until_ready(out)

    ref = _reference(x, weight, bias)
    assert out.shape == (B, S, D_MODEL)
    assert jnp.allclose(out, ref, atol=1e-5, rtol=1e-5), "mismatch vs reference"

    print("KERNEL_OK")
</pallas_src>

<mosaic_0001>
module attributes {stable_mosaic.version = 11 : i64} {
  func.func @_embedding_kernel(%arg0: i32, %arg1: memref<8x16xf32, #tpu.memory_space<vmem>>, %arg2: memref<16x32xf32, #tpu.memory_space<vmem>>, %arg3: memref<1x32xf32, #tpu.memory_space<vmem>>, %arg4: memref<8x32xf32, #tpu.memory_space<vmem>>) attributes {dimension_semantics = [#tpu.dimension_semantics<parallel>], iteration_bounds = array<i64: 2>, scalar_prefetch = 0 : i64, scratch_operands = 0 : i64, tpu.core_type = #tpu.core_type<tc>, window_params = [{transform_indices = @transform_0, window_bounds = array<i64: 8, 16>}, {pipeline_mode = #tpu.pipeline_mode<synchronous>, transform_indices = @transform_1, window_bounds = array<i64: 16, 32>}, {pipeline_mode = #tpu.pipeline_mode<synchronous>, transform_indices = @transform_2, window_bounds = array<i64: 1, 32>}, {transform_indices = @transform_3, window_bounds = array<i64: 8, 32>}]} {
    %c0 = arith.constant 0 : index
    %c0_0 = arith.constant 0 : index
    %0 = vector.load %arg1[%c0, %c0_0] : memref<8x16xf32, #tpu.memory_space<vmem>>, vector<8x16xf32>
    %c0_1 = arith.constant 0 : index
    %c0_2 = arith.constant 0 : index
    %1 = vector.load %arg2[%c0_1, %c0_2] : memref<16x32xf32, #tpu.memory_space<vmem>>, vector<16x32xf32>
    %cst = arith.constant dense<0.000000e+00> : vector<8x32xf32>
    %2 = tpu.matmul %0, %1, %cst {dimension_numbers = #tpu.dot_dimension_numbers<[1], [0], [0], [1], [0, 0, 1, 1], [], []>} : vector<8x16xf32>, vector<16x32xf32>, vector<8x32xf32> -> vector<8x32xf32>
    %c0_3 = arith.constant 0 : index
    %c0_4 = arith.constant 0 : index
    %3 = vector.load %arg3[%c0_3, %c0_4] : memref<1x32xf32, #tpu.memory_space<vmem>>, vector<1x32xf32>
    %4 = vector.broadcast %3 : vector<1x32xf32> to vector<8x32xf32>
    %5 = arith.addf %2, %4 : vector<8x32xf32>
    %cst_5 = arith.constant dense<0xFF800000> : vector<8xf32>
    %6 = vector.multi_reduction <maximumf>, %5, %cst_5 [1] : vector<8x32xf32> to vector<8xf32>
    %7 = vector.shape_cast %6 : vector<8xf32> to vector<8x1xf32>
    %8 = vector.broadcast %7 : vector<8x1xf32> to vector<8x32xf32>
    %9 = arith.subf %5, %8 : vector<8x32xf32>
    %10 = math.exp %9 : vector<8x32xf32>
    %cst_6 = arith.constant dense<0.000000e+00> : vector<8xf32>
    %11 = vector.multi_reduction <add>, %10, %cst_6 [1] : vector<8x32xf32> to vector<8xf32>
    %12 = vector.shape_cast %11 : vector<8xf32> to vector<8x1xf32>
    %13 = tpu.reciprocal %12 : vector<8x1xf32> -> vector<8x1xf32>
    %14 = vector.broadcast %13 : vector<8x1xf32> to vector<8x32xf32>
    %15 = arith.mulf %10, %14 : vector<8x32xf32>
    %c0_7 = arith.constant 0 : index
    %c0_8 = arith.constant 0 : index
    %16 = vector.load %arg4[%c0_7, %c0_8] : memref<8x32xf32, #tpu.memory_space<vmem>>, vector<8x32xf32>
    tpu.vector_store %arg4[%c0_7, %c0_8], %15 {strides = array<i32>} : memref<8x32xf32, #tpu.memory_space<vmem>>, vector<8x32xf32>,
    return
  }
  func.func @transform_0(%arg0: i32) -> (i32, i32) {
    %c0_i32 = arith.constant 0 : i32
    %c0_i32_0 = arith.constant 0 : i32
    return %arg0, %c0_i32 : i32, i32
  }
  func.func @transform_1(%arg0: i32) -> (i32, i32) {
    %c0_i32 = arith.constant 0 : i32
    %c0_i32_0 = arith.constant 0 : i32
    %c0_i32_1 = arith.constant 0 : i32
    return %c0_i32, %c0_i32_0 : i32, i32
  }
  func.func @transform_2(%arg0: i32) -> (i32, i32) {
    %c0_i32 = arith.constant 0 : i32
    %c0_i32_0 = arith.constant 0 : i32
    %c0_i32_1 = arith.constant 0 : i32
    return %c0_i32, %c0_i32_0 : i32, i32
  }
  func.func @transform_3(%arg0: i32) -> (i32, i32) {
    %c0_i32 = arith.constant 0 : i32
    %c0_i32_0 = arith.constant 0 : i32
    return %arg0, %c0_i32 : i32, i32
  }
}

</mosaic_0001>

<bundles_post_ra>
// kernel: tpu_custom_call.1
= control target key start
LH: loop header
LB: loop body
LE: loop exit
PB: predicated region body
PF: predicated region fallthrough
CT: control target
= control target key end

     0   :  { %8 = vsyncpa [#allocation3], 0  ;;  %s798_s0 = inlined_call_operand.hbm [shape: f32[16,16], index: 0, kind: input, shape index: {}]   ;;  %s799_s1 = inlined_call_operand.hbm [shape: f32[16,32], index: 1, kind: input, shape index: {}]   ;;  %s800_s2 = inlined_call_operand.vmem [shape: f32[1,32], index: 2, kind: input, shape index: {}]   ;;  %s801_s3 = inlined_call_operand.hbm [shape: f32[16,32], index: 3, kind: output, shape index: {}]  }
   0x1   :  { %10 = vsyncpa [#allocation3 + $0x1], 0 }
   0x2   :  { %11 = vsyncpa [#allocation6], 0 }
   0x3   :  { %12 = vsyncpa [#allocation4], 0 }
   0x4   :  { %14 = vsyncpa [#allocation4 + $0x1], 0  ;;  %s634_s12 = smov 0   ;;  %s636_s13 = smov 0  }
   0x5   :  { %s638_s14 = smov 0   ;;  %s640_s15 = smov 0  }
   0x6 LB: > { %s655_s16 = sadd.s32 4294967295, %s605_s15   ;;  %s392_s17 = sadd.s32 4294967294, %s605_s15   ;;  %s605_s15 = sphi %s640_s15, %s823_s15   ;;  %s601_s14 = sphi %s638_s14, %s822_s14   ;;  %s597_s13 = sphi %s636_s13, %s821_s13   ;;  %s593_s12 = sphi %s634_s12, %s820_s12  }
   0x7   : > { %p40_p0 = scmp.ne.s32.totalorder %s597_s13, %s593_s12  ;;  %p802_p1 = scmp.eq.s32.totalorder %s655_s16, 0 }
   0x8   : > { %p112_p3 = scmp.eq.s32.totalorder %s392_s17, 1  ;;  %p393_p5 = scmp.ge.s32.totalorder %s605_s15, 1 }
   0x9   : > { %p664_p4 = por %p802_p1, %p40_p0  ;;  %p119_p7 = scmp.lt.s32.totalorder %s605_s15, 3 }
   0xa   : > { %p669_p6 = por %p112_p3, %p40_p0  ;;  %s607_s21 = smov [#allocation5]  }
   0xb   : > { %s806_s18 = scalar_select %p664_p4, 1, 0 }
   0xc   : > { %s807_s19 = scalar_select %p669_p6, 1, 0 }
   0xd   : > { %p674_p8 = pnand %p393_p5, %p119_p7  ;;  %s131_s22 = sshll.u32 %s607_s21, 4  ;;  %s132_s22 = int_to_ptr.vmem [resolvable:$true] %s131_s22 }
   0xe   : > { %s688_s24 = sadd.s32 1, %s605_s15   ;;  %s27_s25 = sadd.s32 1, %s601_s14 }
   0xf   : > { %s808_s20 = scalar_select %p674_p8, 1, 0 }
  0x10   : > { %p426_p9 = pneg %p674_p8  ;;  %s24_s26 = ssub.s32 %s605_s15, %s688_s24 }
  0x11   : > { %s494_s27 = scalar_lea.vmem %s132_s22, 256  ;;  %p502_p5 = scmp.lt.s32.totalorder %s132_s22, %s132_s22 }
  0x12   : > { %p683_p11 = pnand %p426_p9, %p802_p1  ;;  %p495_p13 = scmp.ne.s32.totalorder %s132_s22, %s494_s27 }
  0x13   : > { %p503_p7 = scmp.lt.s32.totalorder %s494_s27, %s494_s27 }
  0x14   : > { %p485_p12 = pneg %p683_p11 }
  0x15   : > { %p504_p10 = por %p503_p7, %p502_p5 }
  0x16   : > { %p497_p0 = pnand %p495_p13, %p485_p12 }
  0x18   : > { %p498_p3 = pneg %p497_p0 }
  0x1a   : > { %p505_p2 = pnand %p504_p10, %p498_p3 }
  0x1c   : > { %508 = shalt.err (!%p505_p2)
}
  0x1d   : > { %s608_s28 = smov 128   ;;  %s609_s29 = smov 8  }
  0x1e   : > { %429 = dma.hbm_to_vmem [thread:$0]  (!%p683_p11), %s799_s1, 256, %s132_s22, [#allocation6], %s608_s28, %s608_s28, %s609_s29  }
  0x1f   : > { %p25_p9 = scmp.eq.s32.totalorder %s24_s26, 0  ;;  %p34_p12 = scmp.ne.s32.totalorder %s601_s14, %s597_s13 }
  0x20   : > { %p35_p10 = scmp.eq.s32.totalorder %s605_s15, 0  ;;  %p439_p2 = scmp.lt.s32.totalorder %s605_s15, 2 }
  0x21   : > { %s705_s5 = scalar_select %p25_p9, %s601_s14, %s27_s25  }
  0x22   : > { %p36_p13 = por %p35_p10, %p34_p12  ;;  %p810_p0 = scmp.eq.s32.totalorder %s655_s16, 1 }
  0x23   : > { %s148_s7 = sand.u32 1, %s601_s14   ;;  %s397_s8 = sshll.u32 %s605_s15, 7 }
  0x24   : > { %p709_p3 = por %p810_p0, %p34_p12  ;;  %s396_s9 = sshll.u32 %s148_s7, 3 }
  0x25   : > { %s718_s17 = scalar_lea.hbm %s798_s0, %s397_s8  ;;  %s152_s21 = scalar_lea.vmem [#allocation2], %s396_s9 }
  0x26   : > { %s811_s6 = scalar_select %p709_p3, 1, 0 }
  0x27   : > { %s159_s22 = sshll.u32 %s152_s21, 4  ;;  %p720_p11 = pnand %p439_p2, %p36_p13  ;;  %s160_s22 = int_to_ptr.vmem [resolvable:$true] %s159_s22 }
  0x28   : > { %s149_s25 = scalar_lea.sflag [#allocation3], %s148_s7  ;;  %s509_s26 = scalar_lea.hbm %s718_s17, 128 }
  0x29   : > { %p510_p5 = scmp.ne.s32.totalorder %s718_s17, %s509_s26  ;;  %p511_p7 = pneg %p720_p11 }
  0x2a   : > { %s514_s29 = scalar_lea.hbm %s798_s0, 256  ;;  %p515_p10 = scmp.lt.s32.totalorder %s718_s17, %s798_s0 }
  0x2b   : > { %p512_p9 = pnand %p511_p7, %p510_p5  ;;  %p516_p2 = scmp.lt.s32.totalorder %s514_s29, %s509_s26 }
  0x2d   : > { %p513_p12 = pneg %p512_p9  ;;  %p517_p13 = por %p516_p2, %p515_p10 }
  0x2f   : > { %p518_p0 = pnand %p517_p13, %p513_p12 }
  0x31   : > { %521 = shalt.err (!%p518_p0)
}
  0x32   : > { %s522_s8 = scalar_lea.vmem %s160_s22, 128  ;;  %s610_s7 = smov [#allocation2]  }
  0x33   : > { %p523_p1 = scmp.ne.s32.totalorder %s160_s22, %s522_s8  ;;  %s527_s9 = sshll.u32 %s610_s7, 4  ;;  %s528_s9 = int_to_ptr.vmem [resolvable:$false] %s527_s9 }
  0x34   : > { %s529_s10 = scalar_lea.vmem %s528_s9, 256  ;;  %p530_p5 = scmp.lt.s32.totalorder %s160_s22, %s528_s9 }
  0x35   : > { %p525_p6 = pnand %p523_p1, %p511_p7  ;;  %p531_p9 = scmp.lt.s32.totalorder %s529_s10, %s522_s8 }
  0x37   : > { %p526_p3 = pneg %p525_p6  ;;  %p532_p4 = por %p531_p9, %p530_p5 }
  0x39   : > { %p533_p8 = pnand %p532_p4, %p526_p3 }
  0x3b   : > { %536 = shalt.err (!%p533_p8)
}
  0x3c   : > { %433 = dma.hbm_to_vmem [thread:$0]  (!%p720_p11), %s718_s17, 128, %s160_s22, %s149_s25  }
  0x3d   : > { %p813_p12 = scmp.ne.s32.totalorder %s808_s20, 0 }
  0x3e   : > { %s741_s11 = sand.u32 (!%p813_p12), 1, %s597_s13   ;;  %p814_p1 = scmp.ne.s32.totalorder (!%p813_p12), %s806_s18, 0 }
  0x3f   : > { %168 = sbr.rel (%p813_p12) target bundleno = 597 (0x255), region = 32  ;;  %s399_s21 = sshll.u32 (!%p813_p12), %s741_s11, 3 }
  0x40   : > { %s171_s26 = scalar_lea.sflag (!%p813_p12), [#allocation3], %s741_s11  ;;  %s174_s27 = scalar_lea.vmem (!%p813_p12), [#allocation2], %s399_s21 }
  0x44   : > { %580 = dma.done.wait (%p814_p1), %s171_s26, 128  }
  0x45   : > { %582 = vsyncadd (%p814_p1), %s171_s26, 4294967168  ;;  %p815_p4 = scmp.eq.s32.totalorder %s655_s16, 0 }
  0x47   : > { %584 = dma.done.wait (%p815_p4), [#allocation6], 256   ;;  %p816_p6 = pmov %p815_p4 }
  0x48   : > { %v611_v0 = vmov 0.0   ;;  %vm612_vm0 = vmmov 0   ;;  %v203_v1 = vld [vmem:[#allocation5 + $0x8] sm:$0xff]  ;;  %v202_v2 = vld [vmem:[#allocation5] sm:$0xff]  ;;  %v201_v3 = vld [vmem:[%s174_s27] sm:$0xff]  ;;  %vm211_vm1 = vcmask 130048  }
  0x49   : > { %586 = vsyncadd (%p816_p6), [#allocation6], 4294967040  ;;  %411 = vmatprep.subr.mxu0 %v611_v0  ;;  %415 = vmatprep.mubr.msk.f32.mxu0 %vm612_vm0, %v611_v0  ;;  %v402_v4 = vld [vmem:[%s800_s2] ss:$0 sm:$0xff]  ;;  %vm285_vm2 = vcmask 261120   ;;  %s405_s17 = sshll.u32 %s655_s16, 7 }
  0x4a   : > { %412 = vmatpush3.msra.mxu0 %v203_v1  ;;  %s200_s22 = scalar_lea.vmem [#allocation7], %s399_s21  ;;  %s310_s29 = scalar_lea.hbm %s801_s3, %s405_s17 }
  0x4b   : > { %413 = vmatprep.subr.mxu0 %v611_v0  ;;  %s312_s23 = sshll.u32 %s200_s22, 4  ;;  %s299_s30 = scalar_lea.sflag [#allocation4], %s741_s11  ;;  %s313_s23 = int_to_ptr.vmem [resolvable:$true] %s312_s23 }
  0x4c   : > { %414 = vmatpush3.msra.mxu0 %v202_v2  ;;  %s537_s4 = scalar_lea.vmem %s313_s23, 128  ;;  %p817_p3 = scmp.ne.s32.totalorder %s811_s6, 0 }
  0x4d   : > { %416 = vmatmul.mubr.msk.f32.vlgmr.msra.gmra.mxu0 %vm211_vm1, %v201_v3  ;;  %p538_p8 = scmp.ne.s32.totalorder %s313_s23, %s537_s4  ;;  %s613_s8 = smov [#allocation7]  }
  0x4e   : > { %s541_s16 = sshll.u32 %s613_s8, 4  ;;  %s542_s16 = int_to_ptr.vmem [resolvable:$false] %s541_s16 }
  0x4f   : > { %p539_p11 = pnand %p538_p8, %p817_p3  ;;  %s543_s7 = scalar_lea.vmem %s542_s16, 256 }
  0x50   : > { %p544_p10 = scmp.lt.s32.totalorder %s313_s23, %s542_s16  ;;  %p545_p2 = scmp.lt.s32.totalorder %s543_s7, %s537_s4 }
  0x51   : > { %p540_p7 = pneg %p539_p11 }
  0x52   : > { %p546_p13 = por %p545_p2, %p544_p10 }
  0x54   : > { %p547_p0 = pnand %p546_p13, %p540_p7 }
 0x10d   : > { %v281_v5 = vpop.f32.mrf.mxu0 }
 0x10e   : > { %v282_v6 = vadd.f32 %v402_v4, %v281_v5 }
 0x10f   : > { %v417_v7 = vpop.f32.mrf.mxu0 }
 0x110   : > { %v286_v8 = vsel %vm285_vm2, %v282_v6, -inf }
 0x111   : > { %287 = vmax.xlane.f32.xlu0 %v286_v8 }
 0x19a   : > { %v288_v9 = vpop.xlane.xlu0 %287 }
 0x19b   : > { %v289_v10 = vsub.f32 %v282_v6, %v288_v9 }
 0x19d   : > { %v290_v11 = vmul.f32 1.442695, %v289_v10 }
 0x19f   : > { %479 = vpow2.f32 %v290_v11 }
 0x1ac   : > { %v480_v12 = vpop.eup %479 }
 0x1ad   : > { %v292_v13 = vsel %vm285_vm2, %v480_v12, 0.0 }
 0x1ae   : > { %293 = vadd.xlane.f32.xlu0 %v292_v13 }
 0x237   : > { %v294_v14 = vpop.xlane.xlu0 %293 }
 0x238   : > { %481 = vrcp.f32 %v294_v14 }
 0x245   : > { %v482_v15 = vpop.eup %481 }
 0x246   : > { %v296_v16 = vmul.f32 %v482_v15, %v480_v12 }
 0x248   : > { %297 = vst.msk [vmem:[%s200_s22] sm:$0xff] %vm285_vm2, %v296_v16 }
 0x249   : > { %550 = shalt.err (!%p547_p0)
}
 0x24a   : > { %s551_s9 = scalar_lea.hbm %s310_s29, 128  ;;  %s555_s21 = scalar_lea.hbm %s801_s3, 256 }
 0x24b   : > { %p552_p5 = scmp.ne.s32.totalorder %s310_s29, %s551_s9  ;;  %p556_p1 = scmp.lt.s32.totalorder %s310_s29, %s801_s3 }
 0x24c   : > { %p557_p4 = scmp.lt.s32.totalorder %s555_s21, %s551_s9 }
 0x24d   : > { %p553_p9 = pnand %p552_p5, %p817_p3 }
 0x24e   : > { %p558_p6 = por %p557_p4, %p556_p1 }
 0x24f   : > { %p554_p12 = pneg %p553_p9 }
 0x251   : > { %p559_p8 = pnand %p558_p6, %p554_p12 }
 0x253   : > { %562 = shalt.err (!%p559_p8)
}
 0x254   : > { %424 = dma.vmem_to_hbm [thread:$0]  (%p817_p3), %s313_s23, 128, %s310_s29, %s299_s30  }
 0x255 PF: > { %s324_s18 = sand.u32 1, %s593_s12   ;;  %p818_p11 = scmp.ne.s32.totalorder %s807_s19, 0 }
 0x256   : > { %p819_p7 = scmp.ge.s32.totalorder %s605_s15, 2  ;;  %s325_s20 = scalar_lea.sflag [#allocation4], %s324_s18 }
 0x258   : > { %p435_p10 = pnand %p819_p7, %p818_p11 }
 0x25a   : > { %p436_p2 = pneg %p435_p10 }
 0x25c   : > { %588 = dma.done.wait (%p436_p2), %s325_s20, 128  }
 0x25d   : > { %590 = vsyncadd (%p436_p2), %s325_s20, 4294967168  ;;  %p17_p13 = scmp.ge.s32.totalorder %s688_s24, 4   ;;  %s820_s12 = smov %s597_s13 }
 0x25e   : > { %s821_s13 = smov %s601_s14  ;;  %s822_s14 = smov %s705_s5 }
 0x25f   : > { %s823_s15 = smov %s688_s24  ;;  %19 = sbr.rel (!%p17_p13) target bundleno = 6 (0x6), region = 81 }
 0x264   :  { %330 = vsyncpa [#allocation3], 1 }
 0x265   :  { %332 = vsyncpa [#allocation3 + $0x1], 1 }
 0x266   :  { %333 = vsyncpa [#allocation6], 1 }
 0x267   :  { %334 = vsyncpa [#allocation4], 1 }
 0x268   :  { %336 = vsyncpa [#allocation4 + $0x1], 1 }

</bundles_post_ra>
